<compile_context>
chip_gen: v7x
topology: tpu7x:2x2x1
jax: 0.10.0
libtpu: 0.0.40
codegen_flags: <defaults>
</compile_context>

<pallas_src>
import math
from functools import partial

import jax
import jax.numpy as jnp
from jax.experimental import pallas as pl
from jax.experimental.pallas import tpu as pltpu


def _group_norm_kernel(x_ref, gamma_ref, beta_ref, o_ref, *, eps, true_spatial, act):
    # x_ref block:      (1, 1, cpg, S_pad)  -- lane-dense, S_pad % 128 == 0
    # gamma/beta block: (1, 1, cpg, 1)      -- broadcasts with no reshape
    cpg = x_ref.shape[-2]
    s_pad = x_ref.shape[-1]
    cnt = cpg * true_spatial
    inv_cnt = 1.0 / float(cnt)

    x = x_ref[...]  # native dtype tile (no persistent f32 copy bound here)

    if true_spatial != s_pad:
        lane = jax.lax.broadcasted_iota(jnp.int32, x.shape, dimension=3)
        mask = lane < true_spatial
    else:
        mask = None

    # Pass 1: mean (f32 accumulation directly from the native-dtype tile).
    if mask is None:
        s = jnp.sum(x, axis=(-2, -1), keepdims=True, dtype=jnp.float32)
    else:
        s = jnp.sum(jnp.where(mask, x, 0), axis=(-2, -1), keepdims=True,
                    dtype=jnp.float32)
    mean = s * inv_cnt  # (1, 1, 1, 1)

    # Pass 2: centered sum of squares (well-conditioned; tile is VMEM-resident
    # so the second pass costs no HBM traffic).
    xc = x.astype(jnp.float32) - mean
    xc_stat = xc if mask is None else jnp.where(mask, xc, 0.0)
    var = jnp.sum(xc_stat * xc_stat, axis=(-2, -1), keepdims=True) * inv_cnt
    inv_std = jax.lax.rsqrt(var + eps)

    gamma = gamma_ref[...].astype(jnp.float32)
    beta = beta_ref[...].astype(jnp.float32)
    y = xc * (inv_std * gamma) + beta

    # Fused epilogue activation (the op that follows GroupNorm in VoxelConv).
    if act == "silu":
        y = y * jax.nn.sigmoid(y)
    elif act == "relu":
        y = jnp.maximum(y, 0.0)
    elif act is not None:
        raise ValueError(f"unsupported fused activation: {act}")

    o_ref[...] = y.astype(o_ref.dtype)


def group_norm(x, gamma, beta, *, num_groups, eps=1e-6, act=None):
    """GroupNorm over an NC<spatial...> tensor, matching torch.nn.GroupNorm,
    with an optional fused elementwise activation on the output."""
    N, C = x.shape[0], x.shape[1]
    spatial = int(math.prod(x.shape[2:]))
    assert C % num_groups == 0
    G = num_groups
    cpg = C // G

    # Lane-dense per-(sample, group) view: last dim = flattened spatial
    # (padded to a multiple of 128), second-to-last = channels-per-group.
    x4 = x.reshape(N, G, cpg, spatial)
    s_pad = max(128, ((spatial + 127) // 128) * 128)
    if s_pad != spatial:
        x4 = jnp.pad(x4, ((0, 0), (0, 0), (0, 0), (0, s_pad - spatial)))
    gamma4 = gamma.reshape(1, G, cpg, 1)
    beta4 = beta.reshape(1, G, cpg, 1)

    # VMEM budget: double-buffered in + out blocks, plus the in-kernel f32
    # centered temp, plus headroom.  Per-(sample, group) blocks keep this
    # small for realistic VoxelEncoder shapes.
    itemsize = jnp.dtype(x.dtype).itemsize
    block_bytes = cpg * s_pad * itemsize
    f32_block = cpg * s_pad * 4
    vmem_need = 2 * block_bytes + 2 * block_bytes + 2 * f32_block + (1 << 20)
    assert vmem_need <= (48 << 20), (
        "per-group slab too large for VMEM"
        # TODO(synk): spatial-split two-pass fallback for this case.
    )
    cp_kwargs = dict(dimension_semantics=("parallel", "parallel"))
    if vmem_need > (16 << 20):  # raise above v5e/v6e/v7x default scoped limits
        cp_kwargs["vmem_limit_bytes"] = int(min(max(vmem_need, 32 << 20), 60 << 20))

    out = pl.pallas_call(
        partial(_group_norm_kernel, eps=eps, true_spatial=spatial, act=act),
        out_shape=jax.ShapeDtypeStruct((N, G, cpg, s_pad), x.dtype),
        grid=(N, G),
        in_specs=[
            pl.BlockSpec((1, 1, cpg, s_pad), lambda n, g: (n, g, 0, 0)),
            pl.BlockSpec((1, 1, cpg, 1), lambda n, g: (0, g, 0, 0)),
            pl.BlockSpec((1, 1, cpg, 1), lambda n, g: (0, g, 0, 0)),
        ],
        out_specs=pl.BlockSpec((1, 1, cpg, s_pad), lambda n, g: (n, g, 0, 0)),
        compiler_params=pltpu.CompilerParams(**cp_kwargs),
    )(x4, gamma4, beta4)

    if s_pad != spatial:
        out = out[..., :spatial]
    return out.reshape(x.shape)


def group_norm_ref(x, gamma, beta, *, num_groups, eps=1e-6, act=None):
    # Pure-JAX reference mirroring torch.nn.GroupNorm over NC<spatial...>.
    N, C = x.shape[0], x.shape[1]
    xg = x.reshape(N, num_groups, -1).astype(jnp.float32)
    mean = xg.mean(axis=-1, keepdims=True)
    var = ((xg - mean) ** 2).mean(axis=-1, keepdims=True)
    xh = ((xg - mean) * jax.lax.rsqrt(var + eps)).reshape(x.shape)
    bshape = (1, C) + (1,) * (x.ndim - 2)
    y = xh * gamma.reshape(bshape).astype(jnp.float32) \
        + beta.reshape(bshape).astype(jnp.float32)
    if act == "silu":
        y = y * jax.nn.sigmoid(y)
    elif act == "relu":
        y = jnp.maximum(y, 0.0)
    return y.astype(x.dtype)


if __name__ == "__main__":
    key = jax.random.PRNGKey(0)
    kx, kg, kb, kx3 = jax.random.split(key, 4)

    # --- 2D feature-map shape: spatial already a multiple of 128 -------------
    N, C, H, W = 2, 16, 16, 16          # channels multiple of 8 (num_groups = C // 8)
    num_groups = C // 8

    x = jax.random.normal(kx, (N, C, H, W), dtype=jnp.float32)
    gamma = 1.0 + 0.1 * jax.random.normal(kg, (C,), dtype=jnp.float32)
    beta = 0.1 * jax.random.normal(kb, (C,), dtype=jnp.float32)

    out = jax.block_until_ready(group_norm(x, gamma, beta, num_groups=num_groups))
    ref = group_norm_ref(x, gamma, beta, num_groups=num_groups)
    assert jnp.allclose(out, ref, atol=1e-5, rtol=1e-5), "mismatch (plain GN)"

    # Fused-activation epilogue (SiLU that follows GroupNorm in VoxelConv).
    out_a = jax.block_until_ready(
        group_norm(x, gamma, beta, num_groups=num_groups, act="silu"))
    ref_a = group_norm_ref(x, gamma, beta, num_groups=num_groups, act="silu")
    assert jnp.allclose(out_a, ref_a, atol=1e-5, rtol=1e-5), "mismatch (GN+SiLU)"

    # --- 3D voxel grid, spatial NOT a multiple of 128 (pad + mask path) ------
    D3 = 6
    x3 = jax.random.normal(kx3, (N, C, D3, D3, D3), dtype=jnp.float32)
    out3 = jax.block_until_ready(
        group_norm(x3, gamma, beta, num_groups=num_groups, act="silu"))
    ref3 = group_norm_ref(x3, gamma, beta, num_groups=num_groups, act="silu")
    assert jnp.allclose(out3, ref3, atol=1e-5, rtol=1e-5), "mismatch (3D padded)"

    print("KERNEL_OK")
</pallas_src>

<mosaic_0001>
module attributes {stable_mosaic.version = 11 : i64} {
  func.func @_group_norm_kernel(%arg0: i32, %arg1: i32, %arg2: memref<1x1x8x256xf32, #tpu.memory_space<vmem>>, %arg3: memref<1x1x8x1xf32, #tpu.memory_space<vmem>>, %arg4: memref<1x1x8x1xf32, #tpu.memory_space<vmem>>, %arg5: memref<1x1x8x256xf32, #tpu.memory_space<vmem>>) attributes {dimension_semantics = [#tpu.dimension_semantics<parallel>, #tpu.dimension_semantics<parallel>], iteration_bounds = array<i64: 2, 2>, scalar_prefetch = 0 : i64, scratch_operands = 0 : i64, tpu.core_type = #tpu.core_type<tc>, window_params = [{transform_indices = @transform_0, window_bounds = array<i64: 1, 1, 8, 256>}, {transform_indices = @transform_1, window_bounds = array<i64: 1, 1, 8, 1>}, {transform_indices = @transform_2, window_bounds = array<i64: 1, 1, 8, 1>}, {transform_indices = @transform_3, window_bounds = array<i64: 1, 1, 8, 256>}]} {
    %c0 = arith.constant 0 : index
    %c0_0 = arith.constant 0 : index
    %c0_1 = arith.constant 0 : index
    %c0_2 = arith.constant 0 : index
    %0 = vector.load %arg2[%c0, %c0_0, %c0_1, %c0_2] : memref<1x1x8x256xf32, #tpu.memory_space<vmem>>, vector<1x1x8x256xf32>
    %cst = arith.constant dense<0.000000e+00> : vector<1x1xf32>
    %1 = vector.multi_reduction <add>, %0, %cst [2, 3] : vector<1x1x8x256xf32> to vector<1x1xf32>
    %2 = vector.shape_cast %1 : vector<1x1xf32> to vector<1x1x1x1xf32>
    %cst_3 = arith.constant 4.8828125E-4 : f32
    %3 = vector.broadcast %cst_3 : f32 to vector<1x1x1x1xf32>
    %4 = arith.mulf %2, %3 : vector<1x1x1x1xf32>
    %5 = vector.broadcast %4 : vector<1x1x1x1xf32> to vector<1x1x8x256xf32>
    %6 = arith.subf %0, %5 : vector<1x1x8x256xf32>
    %7 = arith.mulf %6, %6 : vector<1x1x8x256xf32>
    %cst_4 = arith.constant dense<0.000000e+00> : vector<1x1xf32>
    %8 = vector.multi_reduction <add>, %7, %cst_4 [2, 3] : vector<1x1x8x256xf32> to vector<1x1xf32>
    %9 = vector.shape_cast %8 : vector<1x1xf32> to vector<1x1x1x1xf32>
    %cst_5 = arith.constant 4.8828125E-4 : f32
    %10 = vector.broadcast %cst_5 : f32 to vector<1x1x1x1xf32>
    %11 = arith.mulf %9, %10 : vector<1x1x1x1xf32>
    %cst_6 = arith.constant 9.99999997E-7 : f32
    %12 = vector.broadcast %cst_6 : f32 to vector<1x1x1x1xf32>
    %13 = arith.addf %11, %12 : vector<1x1x1x1xf32>
    %14 = math.rsqrt %13 : vector<1x1x1x1xf32>
    %c0_7 = arith.constant 0 : index
    %c0_8 = arith.constant 0 : index
    %c0_9 = arith.constant 0 : index
    %c0_10 = arith.constant 0 : index
    %15 = vector.load %arg3[%c0_7, %c0_8, %c0_9, %c0_10] : memref<1x1x8x1xf32, #tpu.memory_space<vmem>>, vector<1x1x8x1xf32>
    %c0_11 = arith.constant 0 : index
    %c0_12 = arith.constant 0 : index
    %c0_13 = arith.constant 0 : index
    %c0_14 = arith.constant 0 : index
    %16 = vector.load %arg4[%c0_11, %c0_12, %c0_13, %c0_14] : memref<1x1x8x1xf32, #tpu.memory_space<vmem>>, vector<1x1x8x1xf32>
    %17 = vector.broadcast %14 : vector<1x1x1x1xf32> to vector<1x1x8x1xf32>
    %18 = arith.mulf %17, %15 : vector<1x1x8x1xf32>
    %19 = vector.broadcast %18 : vector<1x1x8x1xf32> to vector<1x1x8x256xf32>
    %20 = arith.mulf %6, %19 : vector<1x1x8x256xf32>
    %21 = vector.broadcast %16 : vector<1x1x8x1xf32> to vector<1x1x8x256xf32>
    %22 = arith.addf %20, %21 : vector<1x1x8x256xf32>
    %c0_15 = arith.constant 0 : index
    %c0_16 = arith.constant 0 : index
    %c0_17 = arith.constant 0 : index
    %c0_18 = arith.constant 0 : index
    %23 = vector.load %arg5[%c0_15, %c0_16, %c0_17, %c0_18] : memref<1x1x8x256xf32, #tpu.memory_space<vmem>>, vector<1x1x8x256xf32>
    tpu.vector_store %arg5[%c0_15, %c0_16, %c0_17, %c0_18], %22 {strides = array<i32>} : memref<1x1x8x256xf32, #tpu.memory_space<vmem>>, vector<1x1x8x256xf32>,
    return
  }
  func.func @transform_0(%arg0: i32, %arg1: i32) -> (i32, i32, i32, i32) {
    %c0_i32 = arith.constant 0 : i32
    %c0_i32_0 = arith.constant 0 : i32
    %c0_i32_1 = arith.constant 0 : i32
    return %arg0, %arg1, %c0_i32, %c0_i32_0 : i32, i32, i32, i32
  }
  func.func @transform_1(%arg0: i32, %arg1: i32) -> (i32, i32, i32, i32) {
    %c0_i32 = arith.constant 0 : i32
    %c0_i32_0 = arith.constant 0 : i32
    %c0_i32_1 = arith.constant 0 : i32
    %c0_i32_2 = arith.constant 0 : i32
    return %c0_i32, %arg1, %c0_i32_0, %c0_i32_1 : i32, i32, i32, i32
  }
  func.func @transform_2(%arg0: i32, %arg1: i32) -> (i32, i32, i32, i32) {
    %c0_i32 = arith.constant 0 : i32
    %c0_i32_0 = arith.constant 0 : i32
    %c0_i32_1 = arith.constant 0 : i32
    %c0_i32_2 = arith.constant 0 : i32
    return %c0_i32, %arg1, %c0_i32_0, %c0_i32_1 : i32, i32, i32, i32
  }
  func.func @transform_3(%arg0: i32, %arg1: i32) -> (i32, i32, i32, i32) {
    %c0_i32 = arith.constant 0 : i32
    %c0_i32_0 = arith.constant 0 : i32
    %c0_i32_1 = arith.constant 0 : i32
    return %arg0, %arg1, %c0_i32, %c0_i32_0 : i32, i32, i32, i32
  }
}

</mosaic_0001>

<bundles_post_ra>
// kernel: tpu_custom_call.1
= control target key start
LH: loop header
LB: loop body
LE: loop exit
PB: predicated region body
PF: predicated region fallthrough
CT: control target
= control target key end

     0   :  { %8 = vsyncpa [#allocation3], 0  ;;  %s875_s0 = inlined_call_operand.hbm [shape: f32[2,2,8,256], index: 0, kind: input, shape index: {}]   ;;  %s876_s1 = inlined_call_operand.vmem [shape: f32[1,2,8,1], index: 1, kind: input, shape index: {}]   ;;  %s877_s2 = inlined_call_operand.vmem [shape: f32[1,2,8,1], index: 2, kind: input, shape index: {}]   ;;  %s878_s3 = inlined_call_operand.hbm [shape: f32[2,2,8,256], index: 3, kind: output, shape index: {}]  }
   0x1   :  { %10 = vsyncpa [#allocation3 + $0x1], 0 }
   0x2   :  { %11 = vsyncpa [#allocation4], 0 }
   0x3   :  { %13 = vsyncpa [#allocation4 + $0x1], 0  ;;  %s669_s12 = smov 0   ;;  %s671_s13 = smov 0  }
   0x4   :  { %s673_s14 = smov 0   ;;  %s675_s15 = smov 0  }
   0x5   :  { %s677_s16 = smov 0   ;;  %s679_s17 = smov 0  }
   0x6   :  { %s681_s18 = smov 0   ;;  %s683_s19 = smov 0  }
   0x7 LB: > { %s414_s20 = sadd.s32 4294967295, %s644_s19   ;;  %s415_s21 = sadd.s32 4294967294, %s644_s19   ;;  %s644_s19 = sphi %s683_s19, %s19_s19   ;;  %s640_s18 = sphi %s681_s18, %s895_s18   ;;  %s636_s17 = sphi %s679_s17, %s894_s17   ;;  %s632_s16 = sphi %s677_s16, %s893_s16   ;;  %s628_s15 = sphi %s675_s15, %s892_s15   ;;  %s624_s14 = sphi %s673_s14, %s891_s14   ;;  %s620_s13 = sphi %s671_s13, %s890_s13   ;;  %s616_s12 = sphi %s669_s12, %s889_s12  }
   0x8   : > { %s28_s22 = sadd.s32 1, %s636_s17  ;;  %s31_s23 = sadd.s32 1, %s640_s18 }
   0x9   : > { %p29_p0 = scmp.ge.s32.totalorder %s28_s22, 2  ;;  %s40_s24 = sadd.s32 1, %s624_s14 }
   0xa   : > { %p47_p1 = scmp.ne.s32.totalorder %s624_s14, %s620_s13  ;;  %p48_p2 = scmp.eq.s32.totalorder %s644_s19, 0 }
   0xb   : > { %s897_s22 = smov (%p29_p0, %s28_s22), 0  ;;  %s899_s23 = smov (!%p29_p0, %s31_s23), %s640_s18 }
   0xc   : > { %s36_s25 = ssub.s32 %s636_s17, %s897_s22  ;;  %p722_p3 = por %p48_p2, %p47_p1 }
   0xd   : > { %p33_p4 = scmp.ge.s32.totalorder %s899_s23, 2  ;;  %p53_p5 = scmp.ne.s32.totalorder %s620_s13, %s616_s12 }
   0xe   : > { %p54_p6 = scmp.eq.s32.totalorder %s414_s20, 0  ;;  %p131_p7 = scmp.eq.s32.totalorder %s414_s20, 3 }
   0xf   : > { %s901_s23 = smov (%p33_p4, %s899_s23), 0  ;;  %p137_p10 = scmp.eq.s32.totalorder %s415_s21, 3 }
  0x10   : > { %p730_p8 = por %p54_p6, %p53_p5  ;;  %p734_p9 = por %p131_p7, %p47_p1 }
  0x11   : > { %s35_s29 = ssub.s32 %s640_s18, %s901_s23  ;;  %p740_p12 = por %p137_p10, %p53_p5 }
  0x12   : > { %s882_s28 = scalar_select %p734_p9, 1, 0 }
  0x13   : > { %s37_s30 = sor.u32 %s36_s25, %s35_s29  ;;  %p445_p13 = scmp.lt.s32.totalorder %s644_s19, 4 }
  0x14   : > { %p38_p11 = scmp.eq.s32.totalorder %s37_s30, 0  ;;  %s157_s5 = sand.u32 1, %s624_s14  }
  0x15   : > { %s883_s4 = scalar_select %p740_p12, 1, 0 }
  0x16   : > { %s747_s6 = scalar_select %p38_p11, %s624_s14, %s40_s24  }
  0x17   : > { %s418_s7 = sshll.u32 %s157_s5, 4  ;;  %s419_s8 = sshll.u32 %s636_s17, 1 }
  0x18   : > { %s420_s9 = sshll.u32 %s640_s18, 2  ;;  %s161_s10 = scalar_lea.vmem [#allocation2], %s418_s7 }
  0x19   : > { %s171_s11 = sshll.u32 %s161_s10, 4  ;;  %s167_s20 = sadd.s32 %s420_s9, %s419_s8  ;;  %s751_s11 = int_to_ptr.vmem [resolvable:$true] %s171_s11 }
  0x1a   : > { %s421_s21 = sshll.u32 %s167_s20, 7  ;;  %p755_p0 = pnand %p445_p13, %p722_p3 }
  0x1b   : > { %s762_s24 = scalar_lea.hbm %s875_s0, %s421_s21  ;;  %s158_s7 = scalar_lea.sflag [#allocation3], %s157_s5 }
  0x1c   : > { %s516_s8 = scalar_lea.hbm %s762_s24, 256  ;;  %p518_p3 = pneg %p755_p0 }
  0x1d   : > { %p517_p4 = scmp.ne.s32.totalorder %s762_s24, %s516_s8  ;;  %s521_s10 = scalar_lea.hbm %s875_s0, 1024 }
  0x1e   : > { %p522_p7 = scmp.lt.u32.totalorder %s762_s24, %s875_s0  ;;  %p523_p10 = scmp.lt.u32.totalorder %s521_s10, %s516_s8 }
  0x1f   : > { %p519_p5 = pnand %p518_p3, %p517_p4  ;;  %p525_p13 = scmp.lt.u32.totalorder %s516_s8, %s762_s24 }
  0x20   : > { %p524_p11 = por %p523_p10, %p522_p7 }
  0x21   : > { %p520_p6 = pneg %p519_p5 }
  0x22   : > { %p526_p1 = por %p525_p13, %p524_p11 }
  0x24   : > { %p527_p2 = pnand %p526_p1, %p520_p6 }
  0x26   : > { %530 = shalt.err (!%p527_p2)
}
  0x27   : > { %s531_s5 = scalar_lea.vmem %s751_s11, 256  ;;  %s646_s29 = smov [#allocation2]  }
  0x28   : > { %p532_p4 = scmp.ne.s32.totalorder %s751_s11, %s531_s5  ;;  %s536_s30 = sshll.u32 %s646_s29, 4  ;;  %s537_s30 = int_to_ptr.vmem [resolvable:$false] %s536_s30 }
  0x29   : > { %s538_s26 = scalar_lea.vmem %s537_s30, 512  ;;  %p539_p9 = scmp.lt.s32.totalorder %s751_s11, %s537_s30 }
  0x2a   : > { %p534_p5 = pnand %p532_p4, %p518_p3  ;;  %p540_p7 = scmp.lt.s32.totalorder %s538_s26, %s531_s5 }
  0x2c   : > { %p535_p12 = pneg %p534_p5  ;;  %p541_p10 = por %p540_p7, %p539_p9 }
  0x2e   : > { %p542_p11 = pnand %p541_p10, %p535_p12 }
  0x30   : > { %545 = shalt.err (!%p542_p11)
}
  0x31   : > { %440 = dma.hbm_to_vmem [thread:$0]  (!%p755_p0), %s762_s24, 256, %s751_s11, %s158_s7  }
  0x32   : > { %p885_p1 = scmp.lt.s32.totalorder %s644_s19, 5  ;;  %p886_p2 = scmp.ge.s32.totalorder %s644_s19, 1 }
  0x34   : > { %p191_p3 = pnand %p886_p2, %p885_p1 }
  0x35   : > { %s796_s8 = sand.u32 (!%p191_p3), 1, %s620_s13  }
  0x36   : > { %194 = sbr.rel (%p191_p3) target bundleno = 546 (0x222), region = 32  ;;  %s423_s9 = sshll.u32 (!%p191_p3), %s796_s8, 4 }
  0x37   : > { %s197_s10 = scalar_lea.sflag (!%p191_p3), [#allocation3], %s796_s8  ;;  %s200_s25 = scalar_lea.vmem (!%p191_p3), [#allocation2], %s423_s9 }
  0x3d   : > { %607 = dma.done.wait (%p730_p8), %s197_s10, 256  }
  0x3e   : > { %609 = vsyncadd (%p730_p8), %s197_s10, 4294967040  ;;  %v239_v0 = vld [vmem:[%s200_s25] sm:$0xff]  ;;  %v240_v1 = vld [vmem:[%s200_s25 + $0x8] sm:$0xff]  ;;  %v647_v16 = vmov 0   ;;  %p231_p8 = scmp.lt.s32.totalorder %s628_s15, 1  ;;  %s428_s30 = sshll.u32 %s628_s15, 1 }
  0x3f   : > { %v241_v2 = vadd.f32 %v240_v1, %v239_v0  ;;  %512 = vset.pattern.permute.xlu1 %v647_v16  ;;  %513 = vset.pattern.permute.xlu0 %v647_v16  ;;  %s429_s26 = sshll.u32 %s632_s16, 2  ;;  %p887_p12 = scmp.ne.s32.totalorder %s882_s28, 0 }
  0x40   : > { %s232_s27 = scalar_select %p231_p8, %s628_s15, 1 }
  0x41   : > { %242 = vadd.xlane.f32.xlu0 %v241_v2  ;;  %s299_s10 = sadd.s32 %s429_s26, %s428_s30  ;;  %s287_s15 = scalar_lea.sflag [#allocation4], %s796_s8 }
  0x42   : > { %s425_s11 = sshll.u32 %s232_s27, 3  ;;  %s430_s25 = sshll.u32 %s299_s10, 7 }
  0x43   : > { %s234_s20 = scalar_lea.vmem %s876_s1, %s425_s11  ;;  %s238_s29 = scalar_lea.vmem %s877_s2, %s425_s11 }
  0x44   : > { %v267_v26 = vld [vmem:[%s234_s20] sm:$0xff]  ;;  %s230_s27 = scalar_lea.vmem [#allocation5], %s423_s9  ;;  %s821_s20 = scalar_lea.hbm %s878_s3, %s430_s25 }
  0x45   : > { %v268_v29 = vld [vmem:[%s238_s29] sm:$0xff]  ;;  %s303_s24 = sshll.u32 %s230_s27, 4  ;;  %s648_s9 = smov [#allocation5]   ;;  %s823_s24 = int_to_ptr.vmem [resolvable:$true] %s303_s24 }
  0x46   : > { %s546_s16 = scalar_lea.vmem %s823_s24, 256  ;;  %s550_s21 = sshll.u32 %s648_s9, 4  ;;  %s551_s21 = int_to_ptr.vmem [resolvable:$false] %s550_s21 }
  0x47   : > { %p547_p9 = scmp.ne.s32.totalorder %s823_s24, %s546_s16  ;;  %s552_s5 = scalar_lea.vmem %s551_s21, 512 }
  0x48   : > { %p553_p13 = scmp.lt.s32.totalorder %s823_s24, %s551_s21  ;;  %p554_p4 = scmp.lt.s32.totalorder %s552_s5, %s546_s16 }
  0x49   : > { %p548_p0 = pnand %p547_p9, %p887_p12 }
  0x4a   : > { %p555_p5 = por %p554_p4, %p553_p13 }
  0x4b   : > { %p549_p6 = pneg %p548_p0 }
  0x4d   : > { %p556_p7 = pnand %p555_p5, %p549_p6 }
  0xce   : > { %v243_v3 = vpop.xlane.xlu0 %242 }
  0xcf   : > { %v244_v4 = vrot.slane %v243_v3, 4 }
  0xd1   : > { %v245_v5 = vadd.f32 %v244_v4, %v243_v3 }
  0xd3   : > { %v246_v6 = vrot.slane %v245_v5, 2 }
  0xd5   : > { %v247_v7 = vadd.f32 %v246_v6, %v245_v5 }
  0xd7   : > { %v248_v8 = vrot.slane %v247_v7, 1 }
  0xd9   : > { %v249_v9 = vadd.f32 %v248_v8, %v247_v7 }
  0xdb   : > { %v250_v10 = vmul.f32 0.00048828125, %v249_v9 }
  0xdd   : > { %v251_v11 = vsub.f32 %v239_v0, %v250_v10  ;;  %v252_v12 = vsub.f32 %v240_v1, %v250_v10 }
  0xdf   : > { %v253_v13 = vmul.f32 %v251_v11, %v251_v11  ;;  %v254_v14 = vmul.f32 %v252_v12, %v252_v12 }
  0xe1   : > { %v255_v15 = vadd.f32 %v254_v14, %v253_v13 }
  0xe3   : > { %256 = vadd.xlane.f32.xlu0 %v255_v15 }
 0x170   : > { %v257_v17 = vpop.xlane.xlu0 %256 }
 0x171   : > { %v258_v18 = vrot.slane %v257_v17, 4 }
 0x173   : > { %v259_v19 = vadd.f32 %v258_v18, %v257_v17 }
 0x175   : > { %v260_v20 = vrot.slane %v259_v19, 2 }
 0x177   : > { %v261_v21 = vadd.f32 %v260_v20, %v259_v19 }
 0x179   : > { %v262_v22 = vrot.slane %v261_v21, 1 }
 0x17b   : > { %v263_v23 = vadd.f32 %v262_v22, %v261_v21 }
 0x17d   : > { %v264_v24 = vmul.f32 0.00048828125, %v263_v23 }
 0x17f   : > { %v265_v25 = vadd.f32 1e-06, %v264_v24 }
 0x181   : > { %514 = vrsqrt.f32 %v265_v25 }
 0x18b   : > { %v515_v27 = vpop.eup %514 }
 0x18c   : > { %v269_v28 = vmul.f32 %v515_v27, %v267_v26 }
 0x18e   : > { %272 = vperm.xlu1 %512, %v269_v28  }
 0x192   : > { %279 = vperm.xlu1 %512, %v268_v29  }
 0x20d   : > { %v273_v30 = vpop.permute.xlu1 %272 }
 0x20e   : > { %v275_v31 = vmul.f32 %v273_v30, %v251_v11  ;;  %v276_v32 = vmul.f32 %v273_v30, %v252_v12 }
 0x211   : > { %v280_v33 = vpop.permute.xlu1 %279 }
 0x212   : > { %v282_v34 = vadd.f32 %v280_v33, %v275_v31  ;;  %v283_v35 = vadd.f32 %v280_v33, %v276_v32 }
 0x214   : > { %284 = vst [vmem:[%s230_s27] sm:$0xff] %v282_v34  ;;  %285 = vst [vmem:[%s230_s27 + $0x8] sm:$0xff] %v283_v35 }
 0x215   : > { %559 = shalt.err (!%p556_p7)
}
 0x216   : > { %s560_s8 = scalar_lea.hbm %s821_s20, 256  ;;  %s564_s26 = scalar_lea.hbm %s878_s3, 1024 }
 0x217   : > { %p561_p10 = scmp.ne.s32.totalorder %s821_s20, %s560_s8  ;;  %p565_p2 = scmp.lt.u32.totalorder %s821_s20, %s878_s3 }
 0x218   : > { %p566_p3 = scmp.lt.u32.totalorder %s564_s26, %s560_s8  ;;  %p568_p9 = scmp.lt.u32.totalorder %s560_s8, %s821_s20 }
 0x219   : > { %p562_p11 = pnand %p561_p10, %p887_p12 }
 0x21a   : > { %p567_p8 = por %p566_p3, %p565_p2 }
 0x21b   : > { %p563_p1 = pneg %p562_p11 }
 0x21c   : > { %p569_p0 = por %p568_p9, %p567_p8 }
 0x21e   : > { %p570_p6 = pnand %p569_p0, %p563_p1 }
 0x220   : > { %573 = shalt.err (!%p570_p6)
}
 0x221   : > { %435 = dma.vmem_to_hbm [thread:$0]  (%p887_p12), %s823_s24, 256, %s821_s20, %s287_s15  }
 0x222 PF: > { %p446_p13 = scmp.ge.s32.totalorder %s644_s19, 2  ;;  %s315_s27 = sand.u32 1, %s616_s12  }
 0x223   : > { %p888_p4 = scmp.ne.s32.totalorder %s883_s4, 0  ;;  %s316_s7 = scalar_lea.sflag [#allocation4], %s315_s27 }
 0x225   : > { %p442_p5 = pnand %p446_p13, %p888_p4 }
 0x227   : > { %611 = dma.done.wait (!%p442_p5), %s316_s7, 256  }
 0x228   : > { %613 = vsyncadd (!%p442_p5), %s316_s7, 4294967040  ;;  %s19_s19 = sadd.s32 1, %s644_s19   ;;  %s889_s12 = smov %s620_s13 }
 0x229   : > { %p16_p7 = scmp.ge.s32.totalorder %s19_s19, 6   ;;  %s890_s13 = smov %s624_s14 }
 0x22a   : > { %s891_s14 = smov %s747_s6  ;;  %s892_s15 = smov %s636_s17 }
 0x22b   : > { %s893_s16 = smov %s640_s18  ;;  %s894_s17 = smov %s897_s22 }
 0x22c   : > { %s895_s18 = smov %s901_s23  ;;  %18 = sbr.rel (!%p16_p7) target bundleno = 7 (0x7), region = 83 }
 0x233   :  { %321 = vsyncpa [#allocation3], 1 }
 0x234   :  { %323 = vsyncpa [#allocation3 + $0x1], 1 }
 0x235   :  { %324 = vsyncpa [#allocation4], 1 }
 0x236   :  { %326 = vsyncpa [#allocation4 + $0x1], 1 }

</bundles_post_ra>
